<compile_context>
chip_gen: v7x
topology: tpu7x:2x2x1
jax: 0.10.0
libtpu: 0.0.40
codegen_flags: <defaults>
</compile_context>

<pallas_src>
import jax
import jax.numpy as jnp
from jax import lax
from jax.experimental import pallas as pl
from jax.experimental.pallas import tpu as pltpu

_LANE = 128


def _round_up(x, m):
    return (x + m - 1) // m * m


def _ffwd_vqk_kernel(toks_ref, emb_ref, pos_ref, wqkv_ref, wo_ref, bo_ref, out_ref):
    """One grid step == one batch element.

    toks_ref : (B, T)   int32, SMEM (scalar-prefetched token ids)
    emb_ref  : (V, P)   f32, token-embedding table, cols E..P zero-padded
    pos_ref  : (T, P)   f32, positional embeddings, cols E..P zero-padded
    wqkv_ref : (P, 3P)  bf16, fused [Wq * E**-0.5 | Wk | Wv], each segment
                        lane-padded to P, rows E..P zero
    wo_ref   : (P, V)   bf16, output projection, rows E..P zero
    bo_ref   : (1, V)   f32, output bias
    out_ref  : (T, V)   f32 logits for this batch element (batch dim squeezed)
    """
    b = pl.program_id(0)
    T = pos_ref.shape[0]
    V, P = emb_ref.shape
    seg = wqkv_ref.shape[1] // 3          # == P (lane-aligned segment width)

    # ---- Embedding gather + positional add (fused into the kernel). -------
    # Exact one-hot gather executed on the MXU; trivial at V=128.
    # TODO(synk): for a real vocabulary (32k+) replace with a scalar-prefetch
    # DMA row-gather of embedding rows from HBM (memory_space=pl.ANY).
    row_ids = lax.broadcasted_iota(jnp.int32, (T, V), 0)
    col_ids = lax.broadcasted_iota(jnp.int32, (T, V), 1)
    onehot = jnp.zeros((T, V), jnp.float32)
    for t in range(T):                    # T is small & static: unrolled selects
        onehot = jnp.where((row_ids == t) & (col_ids == toks_ref[b, t]),
                           1.0, onehot)
    x = jnp.dot(onehot, emb_ref[...],
                preferred_element_type=jnp.float32) + pos_ref[...]   # (T, P) f32

    xb = x.astype(jnp.bfloat16)

    # ---- Fused, lane-aligned Q/K/V projection (one MXU push). -------------
    qkv = jnp.dot(xb, wqkv_ref[...], preferred_element_type=jnp.float32)  # (T, 3P)
    q = qkv[:, :seg]
    k = qkv[:, seg:2 * seg]
    v = qkv[:, 2 * seg:]

    # scores = q @ k^T (contract over head dim; E**-0.5 already folded in Wq).
    scores = lax.dot_general(
        q.astype(jnp.bfloat16), k.astype(jnp.bfloat16),
        dimension_numbers=(((1,), (1,)), ((), ())),
        preferred_element_type=jnp.float32)                               # (T, T)

    # ---- Causal mask generated in-kernel (no HBM mask buffer). -------------
    qpos = lax.broadcasted_iota(jnp.int32, (T, T), 0)
    kpos = lax.broadcasted_iota(jnp.int32, (T, T), 1)
    scores = jnp.where(kpos <= qpos, scores, -1e30)    # finite bias: NaN-safe

    # ---- f32 softmax over the key axis. ------------------------------------
    scores = scores - jnp.max(scores, axis=-1, keepdims=True)
    p = jnp.exp(scores)
    p = p * pl.reciprocal(jnp.sum(p, axis=-1, keepdims=True), approx=True)

    # ---- Attention output + residual (padded cols of v are zero). ----------
    attn = jnp.dot(p.astype(jnp.bfloat16), v.astype(jnp.bfloat16),
                   preferred_element_type=jnp.float32)                    # (T, P)
    hres = x + attn

    # ---- Vocab projection (lane-dense V) + bias. ----------------------------
    logits = jnp.dot(hres.astype(jnp.bfloat16), wo_ref[...],
                     preferred_element_type=jnp.float32) + bo_ref[...]    # (T, V)
    out_ref[...] = logits.astype(out_ref.dtype)


def prepare_params(params):
    """One-time parameter prep (padding / fusion hoisted off the call path)."""
    emb = params["embeddings"].astype(jnp.float32)      # (V, E)
    pos = params["pos_embedd"].astype(jnp.float32)      # (block_size, E)
    V, E = emb.shape
    H = params["wq"].shape[0]
    P = _round_up(max(E, H), _LANE)                     # lane-aligned width

    def pad_cols(a):
        return jnp.pad(a, ((0, 0), (0, P - a.shape[1])))

    def pad_rows(a):
        return jnp.pad(a, ((0, P - a.shape[0]), (0, 0)))

    # Fold the C**-0.5 scale (C = embed_size in the reference module) into Wq.
    wq_t = params["wq"].T * (float(E) ** -0.5)          # (E, H)
    wk_t = params["wk"].T                               # (E, H)
    wv_t = params["wv"].T                               # (E, E)
    wqkv = pad_rows(jnp.concatenate(
        [pad_cols(wq_t), pad_cols(wk_t), pad_cols(wv_t)], axis=1))  # (P, 3P)

    return {
        "emb_p": pad_cols(emb),                                    # (V, P) f32
        "pos_p": pad_cols(pos),                                    # (bs, P) f32
        "wqkv": wqkv.astype(jnp.bfloat16),                         # (P, 3P) bf16
        "wo_t": pad_rows(params["wo"].T).astype(jnp.bfloat16),     # (P, V) bf16
        "bo": params["bo"].reshape(1, V).astype(jnp.float32),      # (1, V)  f32
    }


def ffwd_vqk_forward(toks, prep, next_toks=None):
    """toks: (B, T) int32. Returns (logits (B, T, V), loss-or-None)."""
    B, T = toks.shape
    V, P = prep["emb_p"].shape
    F = prep["wqkv"].shape[1]
    pos = prep["pos_p"][:T]                              # module crops pos to T

    logits = pl.pallas_call(
        _ffwd_vqk_kernel,
        out_shape=jax.ShapeDtypeStruct((B, T, V), jnp.float32),
        grid_spec=pltpu.PrefetchScalarGridSpec(
            num_scalar_prefetch=1,                       # toks -> SMEM
            grid=(B,),                                   # one step per batch element
            in_specs=[
                pl.BlockSpec((V, P), lambda b, tref: (0, 0)),   # emb   (resident)
                pl.BlockSpec((T, P), lambda b, tref: (0, 0)),   # pos   (resident)
                pl.BlockSpec((P, F), lambda b, tref: (0, 0)),   # wqkv  (resident)
                pl.BlockSpec((P, V), lambda b, tref: (0, 0)),   # wo    (resident)
                pl.BlockSpec((1, V), lambda b, tref: (0, 0)),   # bo    (resident)
            ],
            out_specs=pl.BlockSpec((None, T, V), lambda b, tref: (b, 0, 0)),
        ),
        compiler_params=pltpu.CompilerParams(
            dimension_semantics=("parallel",)),          # batch across TCs (v7x)
    )(toks.astype(jnp.int32), prep["emb_p"], pos, prep["wqkv"],
      prep["wo_t"], prep["bo"])

    if next_toks is None:
        loss = None
    else:
        # Cross-entropy branch is cheap glue; computed in plain JAX.
        N = B * T
        logp = jax.nn.log_softmax(logits.reshape(N, V), axis=-1)
        loss = -jnp.mean(jnp.take_along_axis(logp, next_toks.reshape(N, 1), axis=1))
    return logits, loss


def init_params(key, vocab_size, embed_size, head_size, block_size):
    """Deterministic parameter init mirroring the module's __init__ shapes."""
    keys = jax.random.split(key, 7)
    s = 0.02
    return {
        "embeddings": s * jax.random.normal(keys[0], (vocab_size, embed_size), jnp.float32),
        "pos_embedd": s * jax.random.normal(keys[1], (block_size, embed_size), jnp.float32),
        "wq": s * jax.random.normal(keys[2], (head_size, embed_size), jnp.float32),
        "wk": s * jax.random.normal(keys[3], (head_size, embed_size), jnp.float32),
        "wv": s * jax.random.normal(keys[4], (embed_size, embed_size), jnp.float32),
        "wo": s * jax.random.normal(keys[5], (vocab_size, embed_size), jnp.float32),
        "bo": s * jax.random.normal(keys[6], (vocab_size,), jnp.float32),
    }


def _reference_forward(toks, params):
    """Pure-JAX f32 reference of the PyTorch forward, for correctness check."""
    emb, pos = params["embeddings"], params["pos_embedd"]
    wq, wk, wv, wo, bo = (params["wq"], params["wk"], params["wv"],
                          params["wo"], params["bo"])
    B, T = toks.shape
    x = emb[toks] + pos[jnp.arange(T)]
    C = x.shape[2]
    q = x @ wq.T
    k = x @ wk.T
    w = (q @ jnp.swapaxes(k, -2, -1)) * (C ** -0.5)
    tril = jnp.tril(jnp.ones((T, T)))
    w = jnp.where(tril == 0, -jnp.inf, w)
    w = jax.nn.softmax(w, axis=-1)
    x = x + w @ (x @ wv.T)
    return x @ wo.T + bo


if __name__ == "__main__":
    # Small, module-consistent shapes.
    vocab_size = 128
    embed_size = 32
    head_size = 16
    block_size = 8
    B, T = 2, block_size   # seq len == block_size

    root = jax.random.PRNGKey(0)
    pkey, tkey = jax.random.split(root)
    params = init_params(pkey, vocab_size, embed_size, head_size, block_size)
    prep = prepare_params(params)
    toks = jax.random.randint(tkey, (B, T), 0, vocab_size, jnp.int32)

    logits, loss = ffwd_vqk_forward(toks, prep)
    logits = jax.block_until_ready(logits)

    ref = _reference_forward(toks, params)
    assert logits.shape == (B, T, vocab_size)
    assert loss is None
    # bf16 MXU operands with f32 accumulation -> slightly loosened tolerance.
    assert jnp.allclose(logits, ref, atol=2e-3, rtol=2e-2), "mismatch vs reference"

    print("KERNEL_OK")
</pallas_src>

<mosaic_0001>
module attributes {stable_mosaic.version = 11 : i64} {
  func.func @_ffwd_vqk_kernel(%arg0: i32, %arg1: memref<2x8xi32, #tpu.memory_space<smem>>, %arg2: memref<128x128xf32, #tpu.memory_space<vmem>>, %arg3: memref<8x128xf32, #tpu.memory_space<vmem>>, %arg4: memref<128x384xbf16, #tpu.memory_space<vmem>>, %arg5: memref<128x128xbf16, #tpu.memory_space<vmem>>, %arg6: memref<1x128xf32, #tpu.memory_space<vmem>>, %arg7: memref<1x8x128xf32, #tpu.memory_space<vmem>>) attributes {dimension_semantics = [#tpu.dimension_semantics<parallel>], iteration_bounds = array<i64: 2>, scalar_prefetch = 1 : i64, scratch_operands = 0 : i64, tpu.core_type = #tpu.core_type<tc>, window_params = [{pipeline_mode = #tpu.pipeline_mode<synchronous>, transform_indices = @transform_0, window_bounds = array<i64: 128, 128>}, {pipeline_mode = #tpu.pipeline_mode<synchronous>, transform_indices = @transform_1, window_bounds = array<i64: 8, 128>}, {pipeline_mode = #tpu.pipeline_mode<synchronous>, transform_indices = @transform_2, window_bounds = array<i64: 128, 384>}, {pipeline_mode = #tpu.pipeline_mode<synchronous>, transform_indices = @transform_3, window_bounds = array<i64: 128, 128>}, {pipeline_mode = #tpu.pipeline_mode<synchronous>, transform_indices = @transform_4, window_bounds = array<i64: 1, 128>}, {transform_indices = @transform_5, window_bounds = array<i64: 1, 8, 128>}]} {
    %0 = tpu.iota {dimensions = array<i32: 0>} : vector<8x128xi32>
    %1 = tpu.iota {dimensions = array<i32: 1>} : vector<8x128xi32>
    %cst = arith.constant 0.000000e+00 : f32
    %2 = vector.broadcast %cst : f32 to vector<8x128xf32>
    %c0_i32 = arith.constant 0 : i32
    %3 = vector.broadcast %c0_i32 : i32 to vector<8x128xi32>
    %4 = arith.cmpi eq, %0, %3 : vector<8x128xi32>
    %5 = arith.index_cast %arg0 : i32 to index
    %c0 = arith.constant 0 : index
    %6 = memref.load %arg1[%5, %c0] : memref<2x8xi32, #tpu.memory_space<smem>>
    %7 = vector.broadcast %6 : i32 to vector<8x128xi32>
    %8 = arith.cmpi eq, %1, %7 : vector<8x128xi32>
    %9 = arith.andi %4, %8 : vector<8x128xi1>
    %cst_0 = arith.constant 1.000000e+00 : f32
    %10 = vector.broadcast %cst_0 : f32 to vector<8x128xf32>
    %11 = arith.select %9, %10, %2 : vector<8x128xi1>, vector<8x128xf32>
    %c1_i32 = arith.constant 1 : i32
    %12 = vector.broadcast %c1_i32 : i32 to vector<8x128xi32>
    %13 = arith.cmpi eq, %0, %12 : vector<8x128xi32>
    %14 = arith.index_cast %arg0 : i32 to index
    %c1 = arith.constant 1 : index
    %15 = memref.load %arg1[%14, %c1] : memref<2x8xi32, #tpu.memory_space<smem>>
    %16 = vector.broadcast %15 : i32 to vector<8x128xi32>
    %17 = arith.cmpi eq, %1, %16 : vector<8x128xi32>
    %18 = arith.andi %13, %17 : vector<8x128xi1>
    %cst_1 = arith.constant 1.000000e+00 : f32
    %19 = vector.broadcast %cst_1 : f32 to vector<8x128xf32>
    %20 = arith.select %18, %19, %11 : vector<8x128xi1>, vector<8x128xf32>
    %c2_i32 = arith.constant 2 : i32
    %21 = vector.broadcast %c2_i32 : i32 to vector<8x128xi32>
    %22 = arith.cmpi eq, %0, %21 : vector<8x128xi32>
    %23 = arith.index_cast %arg0 : i32 to index
    %c2 = arith.constant 2 : index
    %24 = memref.load %arg1[%23, %c2] : memref<2x8xi32, #tpu.memory_space<smem>>
    %25 = vector.broadcast %24 : i32 to vector<8x128xi32>
    %26 = arith.cmpi eq, %1, %25 : vector<8x128xi32>
    %27 = arith.andi %22, %26 : vector<8x128xi1>
    %cst_2 = arith.constant 1.000000e+00 : f32
    %28 = vector.broadcast %cst_2 : f32 to vector<8x128xf32>
    %29 = arith.select %27, %28, %20 : vector<8x128xi1>, vector<8x128xf32>
    %c3_i32 = arith.constant 3 : i32
    %30 = vector.broadcast %c3_i32 : i32 to vector<8x128xi32>
    %31 = arith.cmpi eq, %0, %30 : vector<8x128xi32>
    %32 = arith.index_cast %arg0 : i32 to index
    %c3 = arith.constant 3 : index
    %33 = memref.load %arg1[%32, %c3] : memref<2x8xi32, #tpu.memory_space<smem>>
    %34 = vector.broadcast %33 : i32 to vector<8x128xi32>
    %35 = arith.cmpi eq, %1, %34 : vector<8x128xi32>
    %36 = arith.andi %31, %35 : vector<8x128xi1>
    %cst_3 = arith.constant 1.000000e+00 : f32
    %37 = vector.broadcast %cst_3 : f32 to vector<8x128xf32>
    %38 = arith.select %36, %37, %29 : vector<8x128xi1>, vector<8x128xf32>
    %c4_i32 = arith.constant 4 : i32
    %39 = vector.broadcast %c4_i32 : i32 to vector<8x128xi32>
    %40 = arith.cmpi eq, %0, %39 : vector<8x128xi32>
    %41 = arith.index_cast %arg0 : i32 to index
    %c4 = arith.constant 4 : index
    %42 = memref.load %arg1[%41, %c4] : memref<2x8xi32, #tpu.memory_space<smem>>
    %43 = vector.broadcast %42 : i32 to vector<8x128xi32>
    %44 = arith.cmpi eq, %1, %43 : vector<8x128xi32>
    %45 = arith.andi %40, %44 : vector<8x128xi1>
    %cst_4 = arith.constant 1.000000e+00 : f32
    %46 = vector.broadcast %cst_4 : f32 to vector<8x128xf32>
    %47 = arith.select %45, %46, %38 : vector<8x128xi1>, vector<8x128xf32>
    %c5_i32 = arith.constant 5 : i32
    %48 = vector.broadcast %c5_i32 : i32 to vector<8x128xi32>
    %49 = arith.cmpi eq, %0, %48 : vector<8x128xi32>
    %50 = arith.index_cast %arg0 : i32 to index
    %c5 = arith.constant 5 : index
    %51 = memref.load %arg1[%50, %c5] : memref<2x8xi32, #tpu.memory_space<smem>>
    %52 = vector.broadcast %51 : i32 to vector<8x128xi32>
    %53 = arith.cmpi eq, %1, %52 : vector<8x128xi32>
    %54 = arith.andi %49, %53 : vector<8x128xi1>
    %cst_5 = arith.constant 1.000000e+00 : f32
    %55 = vector.broadcast %cst_5 : f32 to vector<8x128xf32>
    %56 = arith.select %54, %55, %47 : vector<8x128xi1>, vector<8x128xf32>
    %c6_i32 = arith.constant 6 : i32
    %57 = vector.broadcast %c6_i32 : i32 to vector<8x128xi32>
    %58 = arith.cmpi eq, %0, %57 : vector<8x128xi32>
    %59 = arith.index_cast %arg0 : i32 to index
    %c6 = arith.constant 6 : index
    %60 = memref.load %arg1[%59, %c6] : memref<2x8xi32, #tpu.memory_space<smem>>
    %61 = vector.broadcast %60 : i32 to vector<8x128xi32>
    %62 = arith.cmpi eq, %1, %61 : vector<8x128xi32>
    %63 = arith.andi %58, %62 : vector<8x128xi1>
    %cst_6 = arith.constant 1.000000e+00 : f32
    %64 = vector.broadcast %cst_6 : f32 to vector<8x128xf32>
    %65 = arith.select %63, %64, %56 : vector<8x128xi1>, vector<8x128xf32>
    %c7_i32 = arith.constant 7 : i32
    %66 = vector.broadcast %c7_i32 : i32 to vector<8x128xi32>
    %67 = arith.cmpi eq, %0, %66 : vector<8x128xi32>
    %68 = arith.index_cast %arg0 : i32 to index
    %c7 = arith.constant 7 : index
    %69 = memref.load %arg1[%68, %c7] : memref<2x8xi32, #tpu.memory_space<smem>>
    %70 = vector.broadcast %69 : i32 to vector<8x128xi32>
    %71 = arith.cmpi eq, %1, %70 : vector<8x128xi32>
    %72 = arith.andi %67, %71 : vector<8x128xi1>
    %cst_7 = arith.constant 1.000000e+00 : f32
    %73 = vector.broadcast %cst_7 : f32 to vector<8x128xf32>
    %74 = arith.select %72, %73, %65 : vector<8x128xi1>, vector<8x128xf32>
    %c0_8 = arith.constant 0 : index
    %c0_9 = arith.constant 0 : index
    %75 = vector.load %arg2[%c0_8, %c0_9] : memref<128x128xf32, #tpu.memory_space<vmem>>, vector<128x128xf32>
    %cst_10 = arith.constant dense<0.000000e+00> : vector<8x128xf32>
    %76 = tpu.matmul %74, %75, %cst_10 {dimension_numbers = #tpu.dot_dimension_numbers<[1], [0], [0], [1], [0, 0, 1, 1], [], []>} : vector<8x128xf32>, vector<128x128xf32>, vector<8x128xf32> -> vector<8x128xf32>
    %c0_11 = arith.constant 0 : index
    %c0_12 = arith.constant 0 : index
    %77 = vector.load %arg3[%c0_11, %c0_12] : memref<8x128xf32, #tpu.memory_space<vmem>>, vector<8x128xf32>
    %78 = arith.addf %76, %77 : vector<8x128xf32>
    %79 = arith.truncf %78 : vector<8x128xf32> to vector<8x128xbf16>
    %c0_13 = arith.constant 0 : index
    %c0_14 = arith.constant 0 : index
    %80 = vector.load %arg4[%c0_13, %c0_14] : memref<128x384xbf16, #tpu.memory_space<vmem>>, vector<128x384xbf16>
    %cst_15 = arith.constant dense<0.000000e+00> : vector<8x384xf32>
    %81 = tpu.matmul %79, %80, %cst_15 {dimension_numbers = #tpu.dot_dimension_numbers<[1], [0], [0], [1], [0, 0, 1, 1], [], []>} : vector<8x128xbf16>, vector<128x384xbf16>, vector<8x384xf32> -> vector<8x384xf32>
    %82 = vector.extract_strided_slice %81 {offsets = [0, 0], sizes = [8, 128], strides = [1, 1]} : vector<8x384xf32> to vector<8x128xf32>
    %83 = vector.extract_strided_slice %81 {offsets = [0, 128], sizes = [8, 128], strides = [1, 1]} : vector<8x384xf32> to vector<8x128xf32>
    %84 = vector.extract_strided_slice %81 {offsets = [0, 256], sizes = [8, 128], strides = [1, 1]} : vector<8x384xf32> to vector<8x128xf32>
    %85 = arith.truncf %82 : vector<8x128xf32> to vector<8x128xbf16>
    %86 = arith.truncf %83 : vector<8x128xf32> to vector<8x128xbf16>
    %cst_16 = arith.constant dense<0.000000e+00> : vector<8x8xf32>
    %87 = tpu.matmul %85, %86, %cst_16 {dimension_numbers = #tpu.dot_dimension_numbers<[1], [1], [0], [0], [0, 0, 1, 0], [], []>} : vector<8x128xbf16>, vector<8x128xbf16>, vector<8x8xf32> -> vector<8x8xf32>
    %88 = tpu.iota {dimensions = array<i32: 0>} : vector<8x8xi32>
    %89 = tpu.iota {dimensions = array<i32: 1>} : vector<8x8xi32>
    %90 = arith.cmpi sle, %89, %88 : vector<8x8xi32>
    %cst_17 = arith.constant -1.000000e+30 : f32
    %91 = vector.broadcast %cst_17 : f32 to vector<8x8xf32>
    %92 = arith.select %90, %87, %91 : vector<8x8xi1>, vector<8x8xf32>
    %cst_18 = arith.constant dense<0xFF800000> : vector<8xf32>
    %93 = vector.multi_reduction <maximumf>, %92, %cst_18 [1] : vector<8x8xf32> to vector<8xf32>
    %94 = vector.shape_cast %93 : vector<8xf32> to vector<8x1xf32>
    %95 = vector.broadcast %94 : vector<8x1xf32> to vector<8x8xf32>
    %96 = arith.subf %92, %95 : vector<8x8xf32>
    %97 = math.exp %96 : vector<8x8xf32>
    %cst_19 = arith.constant dense<0.000000e+00> : vector<8xf32>
    %98 = vector.multi_reduction <add>, %97, %cst_19 [1] : vector<8x8xf32> to vector<8xf32>
    %99 = vector.shape_cast %98 : vector<8xf32> to vector<8x1xf32>
    %100 = tpu.reciprocal %99 {approx = true} : vector<8x1xf32> -> vector<8x1xf32>
    %101 = vector.broadcast %100 : vector<8x1xf32> to vector<8x8xf32>
    %102 = arith.mulf %97, %101 : vector<8x8xf32>
    %103 = arith.truncf %102 : vector<8x8xf32> to vector<8x8xbf16>
    %104 = arith.truncf %84 : vector<8x128xf32> to vector<8x128xbf16>
    %cst_20 = arith.constant dense<0.000000e+00> : vector<8x128xf32>
    %105 = tpu.matmul %103, %104, %cst_20 {dimension_numbers = #tpu.dot_dimension_numbers<[1], [0], [0], [1], [0, 0, 1, 1], [], []>} : vector<8x8xbf16>, vector<8x128xbf16>, vector<8x128xf32> -> vector<8x128xf32>
    %106 = arith.addf %78, %105 : vector<8x128xf32>
    %107 = arith.truncf %106 : vector<8x128xf32> to vector<8x128xbf16>
    %c0_21 = arith.constant 0 : index
    %c0_22 = arith.constant 0 : index
    %108 = vector.load %arg5[%c0_21, %c0_22] : memref<128x128xbf16, #tpu.memory_space<vmem>>, vector<128x128xbf16>
    %cst_23 = arith.constant dense<0.000000e+00> : vector<8x128xf32>
    %109 = tpu.matmul %107, %108, %cst_23 {dimension_numbers = #tpu.dot_dimension_numbers<[1], [0], [0], [1], [0, 0, 1, 1], [], []>} : vector<8x128xbf16>, vector<128x128xbf16>, vector<8x128xf32> -> vector<8x128xf32>
    %c0_24 = arith.constant 0 : index
    %c0_25 = arith.constant 0 : index
    %110 = vector.load %arg6[%c0_24, %c0_25] : memref<1x128xf32, #tpu.memory_space<vmem>>, vector<1x128xf32>
    %111 = vector.broadcast %110 : vector<1x128xf32> to vector<8x128xf32>
    %112 = arith.addf %109, %111 : vector<8x128xf32>
    %c0_26 = arith.constant 0 : index
    %c0_27 = arith.constant 0 : index
    %c0_28 = arith.constant 0 : index
    %113 = vector.load %arg7[%c0_26, %c0_27, %c0_28] : memref<1x8x128xf32, #tpu.memory_space<vmem>>, vector<1x8x128xf32>
    %114 = vector.shape_cast %113 : vector<1x8x128xf32> to vector<8x128xf32>
    %115 = vector.shape_cast %112 : vector<8x128xf32> to vector<1x8x128xf32>
    tpu.vector_store %arg7[%c0_26, %c0_27, %c0_28], %115 {strides = array<i32>} : memref<1x8x128xf32, #tpu.memory_space<vmem>>, vector<1x8x128xf32>,
    return
  }
  func.func @transform_0(%arg0: i32, %arg1: memref<2x8xi32, #tpu.memory_space<smem>>) -> (i32, i32) {
    %c0_i32 = arith.constant 0 : i32
    %c0_i32_0 = arith.constant 0 : i32
    %c0_i32_1 = arith.constant 0 : i32
    return %c0_i32, %c0_i32_0 : i32, i32
  }
  func.func @transform_1(%arg0: i32, %arg1: memref<2x8xi32, #tpu.memory_space<smem>>) -> (i32, i32) {
    %c0_i32 = arith.constant 0 : i32
    %c0_i32_0 = arith.constant 0 : i32
    %c0_i32_1 = arith.constant 0 : i32
    return %c0_i32, %c0_i32_0 : i32, i32
  }
  func.func @transform_2(%arg0: i32, %arg1: memref<2x8xi32, #tpu.memory_space<smem>>) -> (i32, i32) {
    %c0_i32 = arith.constant 0 : i32
    %c0_i32_0 = arith.constant 0 : i32
    %c0_i32_1 = arith.constant 0 : i32
    return %c0_i32, %c0_i32_0 : i32, i32
  }
  func.func @transform_3(%arg0: i32, %arg1: memref<2x8xi32, #tpu.memory_space<smem>>) -> (i32, i32) {
    %c0_i32 = arith.constant 0 : i32
    %c0_i32_0 = arith.constant 0 : i32
    %c0_i32_1 = arith.constant 0 : i32
    return %c0_i32, %c0_i32_0 : i32, i32
  }
  func.func @transform_4(%arg0: i32, %arg1: memref<2x8xi32, #tpu.memory_space<smem>>) -> (i32, i32) {
    %c0_i32 = arith.constant 0 : i32
    %c0_i32_0 = arith.constant 0 : i32
    %c0_i32_1 = arith.constant 0 : i32
    return %c0_i32, %c0_i32_0 : i32, i32
  }
  func.func @transform_5(%arg0: i32, %arg1: memref<2x8xi32, #tpu.memory_space<smem>>) -> (i32, i32, i32) {
    %c0_i32 = arith.constant 0 : i32
    %c0_i32_0 = arith.constant 0 : i32
    %c0_i32_1 = arith.constant 0 : i32
    return %arg0, %c0_i32, %c0_i32_0 : i32, i32, i32
  }
}

</mosaic_0001>

<bundles_post_ra>
// kernel: tpu_custom_call.1
= control target key start
LH: loop header
LB: loop body
LE: loop exit
PB: predicated region body
PF: predicated region fallthrough
CT: control target
= control target key end

     0   :  { %s1916_s0 = inlined_call_operand.hbm [shape: s32[2,8], index: 0, kind: input, shape index: {}]   ;;  %s1917_s1 = inlined_call_operand.hbm [shape: f32[128,128], index: 1, kind: input, shape index: {}]   ;;  %s1918_s2 = inlined_call_operand.hbm [shape: f32[8,128], index: 2, kind: input, shape index: {}]   ;;  %s1919_s3 = inlined_call_operand.hbm [shape: bf16[128,384], index: 3, kind: input, shape index: {}]   ;;  %s1920_s4 = inlined_call_operand.hbm [shape: bf16[128,128], index: 4, kind: input, shape index: {}]   ;;  %s1921_s5 = inlined_call_operand.vmem [shape: f32[1,128], index: 5, kind: input, shape index: {}]   ;;  %s1922_s6 = inlined_call_operand.hbm [shape: f32[2,8,128], index: 6, kind: output, shape index: {}]  }
   0x1   :  { %1926 = sst [smem:[#allocation18_spill]] %s1917_s1  ;;  %s1312_s23 = scalar_lea.hbm %s1916_s0, 32 }
   0x2   :  { %p1313_p0 = scmp.ne.s32.totalorder %s1916_s0, %s1312_s23  ;;  %p1316_p1 = scmp.lt.u32.totalorder %s1312_s23, %s1916_s0 }
   0x4   :  { %p1318_p2 = pnand %p1316_p1, %p1313_p0 }
   0x6   :  { %1321 = shalt.err (!%p1318_p2)  }
   0x7   :  { %s1512_s28 = smov [#allocation3]  }
   0x8   :  { %12 = dma.hbm_to_smem %s1916_s0, 32, %s1512_s28, [#allocation2] }
   0x9   :  { %1478 = dma.done.wait [#allocation2], 32 }
   0xa   :  { %1479 = vsyncadd [#allocation2], 4294967264 }
   0xb   :  { %14 = sfence }
   0xc   :  { %15 = vsyncpa [#allocation5], 0 }
   0xd   :  { %16 = vsyncpa [#allocation8], 0 }
   0xe   :  { %17 = vsyncpa [#allocation11], 0 }
   0xf   :  { %18 = vsyncpa [#allocation6], 0 }
  0x10   :  { %20 = vsyncpa [#allocation6 + $0x1], 0  ;;  %s1575_s7 = smov 0   ;;  %s1577_s8 = smov 0  }
  0x11   :  { %s1579_s9 = smov 0   ;;  %s1581_s10 = smov 0  }
  0x12 LB: > { %s1596_s0 = sadd.s32 4294967295, %s1510_s10   ;;  %s976_s11 = sadd.s32 4294967294, %s1510_s10   ;;  %s1510_s10 = sphi %s1581_s10, %s1955_s10   ;;  %s1506_s9 = sphi %s1579_s9, %s1954_s9   ;;  %s1502_s8 = sphi %s1577_s8, %s1953_s8   ;;  %s1498_s7 = sphi %s1575_s7, %s1952_s7  }
  0x13   : > { %s1600_s12 = sadd.s32 1, %s1510_s10   ;;  %s138_s13 = sadd.s32 1, %s1506_s9 }
  0x14   : > { %s135_s14 = ssub.s32 %s1510_s10, %s1600_s12  ;;  %p148_p3 = scmp.ne.s32.totalorder %s1506_s9, %s1502_s8 }
  0x15   : > { %p136_p4 = scmp.eq.s32.totalorder %s135_s14, 0  ;;  %p149_p5 = scmp.eq.s32.totalorder %s1596_s0, 1 }
  0x16   : > { %p154_p6 = scmp.ne.s32.totalorder %s1502_s8, %s1498_s7  ;;  %p155_p7 = scmp.eq.s32.totalorder %s976_s11, 1 }
  0x17   : > { %s1611_s15 = scalar_select %p136_p4, %s1506_s9, %s138_s13  }
  0x18   : > { %p1613_p8 = por %p149_p5, %p148_p3  ;;  %p1617_p9 = por %p155_p7, %p154_p6 }
  0x19   : > { %p977_p10 = scmp.ge.s32.totalorder %s1510_s10, 1  ;;  %p162_p11 = scmp.lt.s32.totalorder %s1510_s10, 3 }
  0x1a   : > { %s1927_s16 = scalar_select %p1613_p8, 1, 0 }
  0x1b   : > { %s1928_s17 = scalar_select %p1617_p9, 1, 0 }
  0x1c   : > { %p1923_p12 = scmp.eq.s32.totalorder %s1596_s0, 0  ;;  %p1624_p13 = pnand %p977_p10, %p162_p11 }
  0x1d   : > { %s1513_s19 = smov [#allocation7]   ;;  %s1514_s21 = smov [#allocation4]  }
  0x1e   : > { %s1929_s18 = scalar_select %p1624_p13, 1, 0 }
  0x1f   : > { %s188_s20 = sshll.u32 %s1513_s19, 4  ;;  %p1195_p0 = pneg %p1624_p13  ;;  %s189_s20 = int_to_ptr.vmem [resolvable:$true] %s188_s20 }
  0x20   : > { %s174_s22 = sshll.u32 %s1514_s21, 4  ;;  %s1515_s24 = smov [#allocation9]   ;;  %s1636_s22 = int_to_ptr.vmem [resolvable:$true] %s174_s22 }
  0x21   : > { %p1632_p1 = pnand %p1923_p12, %p1195_p0  ;;  %s1638_s25 = sshll.u32 %s1515_s24, 4  ;;  %s199_s25 = int_to_ptr.vmem [resolvable:$true] %s1638_s25 }
  0x22   : > { %s1322_s28 = scalar_lea.hbm %s1918_s2, 128 }
  0x23   : > { %p1323_p2 = scmp.ne.s32.totalorder %s1918_s2, %s1322_s28  ;;  %p1648_p3 = pneg %p1632_p1 }
  0x24   : > { %p1329_p6 = scmp.lt.u32.totalorder %s1322_s28, %s1918_s2 }
  0x25   : > { %p1325_p4 = pnand %p1648_p3, %p1323_p2 }
  0x27   : > { %p1326_p5 = pneg %p1325_p4 }
  0x29   : > { %p1331_p7 = pnand %p1329_p6, %p1326_p5 }
  0x2b   : > { %1334 = shalt.err (!%p1331_p7)
}
  0x2c   : > { %s1335_s19 = scalar_lea.vmem %s189_s20, 128  ;;  %p1343_p12 = scmp.lt.s32.totalorder %s189_s20, %s189_s20 }
  0x2d   : > { %p1336_p10 = scmp.ne.s32.totalorder %s189_s20, %s1335_s19  ;;  %p1344_p9 = scmp.lt.s32.totalorder %s1335_s19, %s1335_s19 }
  0x2f   : > { %p1338_p11 = pnand %p1336_p10, %p1648_p3  ;;  %p1345_p8 = por %p1344_p9, %p1343_p12 }
  0x31   : > { %p1339_p0 = pneg %p1338_p11 }
  0x33   : > { %p1346_p13 = pnand %p1345_p8, %p1339_p0 }
  0x35   : > { %1349 = shalt.err (!%p1346_p13)
}
  0x36   : > { %1201 = dma.hbm_to_vmem [thread:$0]  (!%p1632_p1), %s1918_s2, 128, %s189_s20, [#allocation8]  }
  0x37   : > { %s1932_s1 = sld [smem:[#allocation18_spill]] }
  0x3d   : > { %s1350_s28 = scalar_lea.hbm %s1932_s1, 2048 }
  0x3e   : > { %p1351_p2 = scmp.ne.s32.totalorder %s1932_s1, %s1350_s28  ;;  %p1357_p8 = scmp.lt.u32.totalorder %s1350_s28, %s1932_s1 }
  0x40   : > { %p1353_p4 = pnand %p1351_p2, %p1648_p3 }
  0x42   : > { %p1354_p9 = pneg %p1353_p4 }
  0x44   : > { %p1359_p12 = pnand %p1357_p8, %p1354_p9 }
  0x46   : > { %1362 = shalt.err (!%p1359_p12)
}
  0x47   : > { %s1363_s20 = scalar_lea.vmem %s1636_s22, 2048  ;;  %p1371_p7 = scmp.lt.s32.totalorder %s1636_s22, %s1636_s22 }
  0x48   : > { %p1364_p13 = scmp.ne.s32.totalorder %s1636_s22, %s1363_s20  ;;  %p1372_p10 = scmp.lt.s32.totalorder %s1363_s20, %s1363_s20 }
  0x4a   : > { %p1366_p5 = pnand %p1364_p13, %p1648_p3  ;;  %p1373_p11 = por %p1372_p10, %p1371_p7 }
  0x4c   : > { %p1367_p6 = pneg %p1366_p5 }
  0x4e   : > { %p1374_p0 = pnand %p1373_p11, %p1367_p6 }
  0x50   : > { %1377 = shalt.err (!%p1374_p0)
}
  0x51   : > { %s1516_s19 = smov 128   ;;  %s1517_s21 = smov 8  }
  0x52   : > { %1198 = dma.hbm_to_vmem [thread:$0]  (!%p1632_p1), %s1932_s1, 2048, %s1636_s22, [#allocation5], %s1516_s19, %s1516_s19, %s1517_s21  }
  0x53   : > { %s1378_s29 = scalar_lea.hbm %s1919_s3, 3072 }
  0x54   : > { %p1379_p2 = scmp.ne.s32.totalorder %s1919_s3, %s1378_s29  ;;  %p1385_p8 = scmp.lt.u32.totalorder %s1378_s29, %s1919_s3 }
  0x56   : > { %p1381_p4 = pnand %p1379_p2, %p1648_p3 }
  0x58   : > { %p1382_p9 = pneg %p1381_p4 }
  0x5a   : > { %p1387_p12 = pnand %p1385_p8, %p1382_p9 }
  0x5c   : > { %1390 = shalt.err (!%p1387_p12)
}
  0x5d   : > { %s1391_s24 = scalar_lea.vmem %s199_s25, 3072  ;;  %p1399_p7 = scmp.lt.s32.totalorder %s199_s25, %s199_s25 }
  0x5e   : > { %p1392_p13 = scmp.ne.s32.totalorder %s199_s25, %s1391_s24  ;;  %p1400_p10 = scmp.lt.s32.totalorder %s1391_s24, %s1391_s24 }
  0x60   : > { %p1394_p5 = pnand %p1392_p13, %p1648_p3  ;;  %p1401_p11 = por %p1400_p10, %p1399_p7 }
  0x62   : > { %p1395_p6 = pneg %p1394_p5 }
  0x64   : > { %p1402_p0 = pnand %p1401_p11, %p1395_p6 }
  0x66   : > { %1405 = shalt.err (!%p1402_p0)
}
  0x67   : > { %s1518_s22 = smov 192   ;;  %s1519_s19 = smov 12  }
  0x68   : > { %1204 = dma.hbm_to_vmem [thread:$0]  (!%p1632_p1), %s1919_s3, 3072, %s199_s25, [#allocation8], %s1518_s22, %s1518_s22, %s1519_s19  }
  0x69   : > { %s1520_s27 = smov [#allocation10]   ;;  %s1406_s13 = scalar_lea.hbm %s1920_s4, 1024 }
  0x6a   : > { %s211_s28 = sshll.u32 %s1520_s27, 4  ;;  %p1407_p2 = scmp.ne.s32.totalorder %s1920_s4, %s1406_s13  ;;  %s212_s28 = int_to_ptr.vmem [resolvable:$true] %s211_s28 }
  0x6b   : > { %p1413_p8 = scmp.lt.u32.totalorder %s1406_s13, %s1920_s4 }
  0x6c   : > { %p1409_p4 = pnand %p1407_p2, %p1648_p3 }
  0x6e   : > { %p1410_p9 = pneg %p1409_p4 }
  0x70   : > { %p1415_p12 = pnand %p1413_p8, %p1410_p9 }
  0x72   : > { %1418 = shalt.err (!%p1415_p12)
}
  0x73   : > { %s1419_s25 = scalar_lea.vmem %s212_s28, 1024  ;;  %p1427_p7 = scmp.lt.s32.totalorder %s212_s28, %s212_s28 }
  0x74   : > { %p1420_p13 = scmp.ne.s32.totalorder %s212_s28, %s1419_s25  ;;  %p1428_p10 = scmp.lt.s32.totalorder %s1419_s25, %s1419_s25 }
  0x76   : > { %p1422_p5 = pnand %p1420_p13, %p1648_p3  ;;  %p1429_p11 = por %p1428_p10, %p1427_p7 }
  0x78   : > { %p1423_p6 = pneg %p1422_p5 }
  0x7a   : > { %p1430_p0 = pnand %p1429_p11, %p1423_p6 }
  0x7c   : > { %1433 = shalt.err (!%p1430_p0)
}
  0x7d   : > { %s1521_s22 = smov 64   ;;  %s1522_s19 = smov 4  }
  0x7e   : > { %1207 = dma.hbm_to_vmem [thread:$0]  (!%p1632_p1), %s1920_s4, 1024, %s212_s28, [#allocation11], %s1521_s22, %s1521_s22, %s1522_s19  }
  0x7f   : > { %p1933_p2 = scmp.ne.s32.totalorder %s1929_s18, 0 }
  0x80   : > { %p1934_p4 = scmp.eq.s32.totalorder (!%p1933_p2), %s1596_s0, 0 }
  0x81   : > { %230 = sbr.rel (%p1933_p2) target bundleno = 1590 (0x636), region = 40 }
  0x88   : > { %1481 = dma.done.wait (%p1934_p4), [#allocation5], 2048   ;;  %p1935_p3 = pmov %p1934_p4 }
  0x8a   : > { %1483 = vsyncadd (%p1935_p3), [#allocation5], 4294965248  ;;  %p1936_p9 = pmov %p1935_p3 }
  0x8b   : > { %p1937_p8 = pmov %p1935_p3 }
  0x8c   : > { %1485 = dma.done.wait (%p1936_p9), [#allocation8], 3200  }
  0x8d   : > { %1487 = vsyncadd (%p1937_p8), [#allocation8], 4294964096  ;;  %p1938_p12 = pmov %p1935_p3 }
  0x8e   : > { %p1939_p1 = pmov %p1935_p3 }
  0x8f   : > { %1489 = dma.done.wait (%p1938_p12), [#allocation11], 1024  }
  0x90   : > { %1491 = vsyncadd (%p1939_p1), [#allocation11], 4294966272  ;;  %s1739_s18 = sshll.u32 %s1596_s0, 7  ;;  %v1523_v0 = vmov 0.0|0.0   ;;  %vm1524_vm0 = vmmov 0   ;;  %v1525_v1 = vmov 0.0   ;;  %v266_v2 = vlaneseq }
  0x91   : > { %1153 = vmatprep.subr.bf16.mxu0 %v1523_v0  ;;  %1098 = vmatprep.mubr.msk.f32.mxu0 %vm1524_vm0, %v1525_v1  ;;  %s272_s23 = sld [smem:[#allocation3 + %s1739_s18]]  ;;  %s278_s11 = sadd.s32 1, %s1739_s18  ;;  %v326_v5 = vld [vmem:[#allocation4] sm:$0xff]  ;;  %v327_v6 = vld [vmem:[#allocation4 + $0x8] sm:$0xff]  ;;  %v328_v7 = vld [vmem:[#allocation4 + $0x10] sm:$0xff] }
  0x92   : > { %s279_s26 = sld [smem:[#allocation3 + %s278_s11]]  ;;  %s285_s27 = sadd.s32 2, %s1739_s18  ;;  %v1750_v3 = vshrl.u32 %v266_v2, 7  ;;  %v1752_v4 = vand.u32 127, %v266_v2  ;;  %v1154_v9 = vpack.c.bf16 %v327_v6, %v326_v5  ;;  %v329_v10 = vld [vmem:[#allocation4 + $0x18] sm:$0xff]  ;;  %v330_v13 = vld [vmem:[#allocation4 + $0x20] sm:$0xff] }
  0x93   : > { %s1747_s0 = sld [smem:[#allocation3 + %s285_s27]]  ;;  %s292_s28 = sadd.s32 3, %s1739_s18  ;;  %v1157_v12 = vpack.c.bf16 %v329_v10, %v328_v7  ;;  %v331_v14 = vld [vmem:[#allocation4 + $0x28] sm:$0xff]  ;;  %v332_v22 = vld [vmem:[#allocation4 + $0x30] sm:$0xff]  ;;  %v333_v23 = vld [vmem:[#allocation4 + $0x38] sm:$0xff] }
  0x94   : > { %s1754_s29 = sld [smem:[#allocation3 + %s292_s28]]  ;;  %s299_s30 = sadd.s32 4, %s1739_s18  ;;  %vm270_vm1 = vcmp.eq.s32.totalorder %v1750_v3, 0  ;;  %1155 = vmatpush3.bf16.msra.mxu0 %v1154_v9  ;;  %vm277_vm3 = vcmp.eq.s32.totalorder %v1750_v3, 1  ;;  %v1268_v17 = vld [vmem:[#allocation9 + $0x4] ss:$12 sps:$4 sm:$0xff]   ;;  %v1160_v18 = vpack.c.bf16 %v331_v14, %v330_v13  ;;  %v1163_v28 = vpack.c.bf16 %v333_v23, %v332_v22 }
  0x95   : > { %s1759_s13 = sld [smem:[#allocation3 + %s299_s30]]  ;;  %s306_s14 = sadd.s32 5, %s1739_s18  ;;  %1156 = vmatprep.subr.bf16.mxu0 %v1523_v0  ;;  %vm284_vm7 = vcmp.eq.s32.totalorder %v1750_v3, 2  ;;  %v1270_v21 = vld [vmem:[#allocation9] ss:$12 sps:$4 sm:$0xff]   ;;  %574 = vmatprep.subr.bf16.mxu1 %v1268_v17  ;;  %vm291_vm9 = vcmp.eq.s32.totalorder %v1750_v3, 3 }
  0x96   : > { %s313_s20 = sadd.s32 6, %s1739_s18  ;;  %s1767_s24 = sld [smem:[#allocation3 + %s306_s14]]  ;;  %575 = vmatpush1.bf16.msra.mxu1 %v1270_v21  ;;  %v1272_v26 = vld [vmem:[#allocation9 + $0x1c] ss:$12 sps:$4 sm:$0xff]   ;;  %v1274_v27 = vld [vmem:[#allocation9 + $0x18] ss:$12 sps:$4 sm:$0xff]  }
  0x97   : > { %v273_v8 = vstv %s272_s23  ;;  %s1770_s25 = sld [smem:[#allocation3 + %s313_s20]]  ;;  %s320_s22 = sadd.s32 7, %s1739_s18  ;;  %v334_v29 = vld [vmem:[#allocation4 + $0x40] sm:$0xff]  ;;  %v335_v30 = vld [vmem:[#allocation4 + $0x48] sm:$0xff]  ;;  %vm298_vm13 = vcmp.eq.s32.totalorder %v1750_v3, 4  ;;  %576 = vmatprep.subr.bf16.mxu1 %v1272_v26  ;;  %v336_v36 = vld [vmem:[#allocation4 + $0x50] sm:$0xff] }
  0x98   : > { %v280_v11 = vstv %s279_s26  ;;  %vm274_vm2 = vcmp.eq.s32.totalorder %v1752_v4, %v273_v8  ;;  %1158 = vmatpush3.bf16.msra.mxu0 %v1157_v12  ;;  %s1783_s19 = sld [smem:[#allocation3 + %s320_s22]]  ;;  %v1276_v34 = vld [vmem:[#allocation9 + $0x34] ss:$12 sps:$4 sm:$0xff]   ;;  %v1278_v35 = vld [vmem:[#allocation9 + $0x30] ss:$12 sps:$4 sm:$0xff]   ;;  %v1166_v39 = vpack.c.bf16 %v335_v30, %v334_v29  ;;  %v340_v52 = vld [vmem:[#allocation4 + $0x70] sm:$0xff] }
  0x99   : > { %vm281_vm4 = vcmp.eq.s32.totalorder %v1752_v4, %v280_v11  ;;  %v287_v15 = vstv %s1747_s0  ;;  %vm275_vm5 = vmand %vm270_vm1, %vm274_vm2  ;;  %1159 = vmatprep.subr.bf16.mxu0 %v1523_v0  ;;  %v337_v37 = vld [vmem:[#allocation4 + $0x58] sm:$0xff]  ;;  %v1280_v40 = vld [vmem:[#allocation9 + $0x4c] ss:$12 sps:$4 sm:$0xff]   ;;  %vm305_vm1 = vcmp.eq.s32.totalorder %v1750_v3, 5  ;;  %v1526_v13 = vmov 0   ;;  %s262_s21 = sand.u32 1, %s1502_s8  }
  0x9a   : > { %v294_v16 = vstv %s1754_s29  ;;  %v276_v19 = vsel %vm275_vm5, 1.0, %v1525_v1  ;;  %vm1774_vm6 = vmand %vm277_vm3, %vm281_vm4  ;;  %vm288_vm8 = vcmp.eq.s32.totalorder %v1752_v4, %v287_v15  ;;  %577 = vmatpush1.bf16.msra.mxu1 %v1274_v27  ;;  %vm312_vm3 = vcmp.eq.s32.totalorder %v1750_v3, 6  ;;  %v1282_v43 = vld [vmem:[#allocation9 + $0x48] ss:$12 sps:$4 sm:$0xff]   ;;  %v338_v44 = vld [vmem:[#allocation4 + $0x60] sm:$0xff]  ;;  %606 = vmatprep.mubr.bf16.mxu1 %v1526_v13  ;;  %s987_s1 = sshll.u32 %s262_s21, 3  ;;  %s1874_s29 = scalar_lea.hbm %s1922_s6, %s1739_s18 }
  0x9b   : > { %vm295_vm10 = vcmp.eq.s32.totalorder %v1752_v4, %v294_v16  ;;  %v283_v24 = vsel %vm1774_vm6, 1.0, %v276_v19  ;;  %vm289_vm11 = vmand %vm284_vm7, %vm288_vm8  ;;  %v301_v25 = vstv %s1759_s13  ;;  %578 = vmatprep.subr.bf16.mxu1 %v1276_v34  ;;  %v1284_v45 = vld [vmem:[#allocation9 + $0x64] ss:$12 sps:$4 sm:$0xff]   ;;  %v1169_v46 = vpack.c.bf16 %v337_v37, %v336_v36  ;;  %v1286_v51 = vld [vmem:[#allocation9 + $0x60] ss:$12 sps:$4 sm:$0xff]   ;;  %s264_s26 = scalar_lea.vmem [#allocation12], %s987_s1 }
  0x9c   : > { %1161 = vmatpush3.bf16.msra.mxu0 %v1160_v18  ;;  %vm1789_vm12 = vmand %vm291_vm9, %vm295_vm10  ;;  %v290_v32 = vsel %vm289_vm11, 1.0, %v283_v24  ;;  %vm302_vm14 = vcmp.eq.s32.totalorder %v1752_v4, %v301_v25  ;;  %v308_v33 = vstv %s1767_s24  ;;  %v339_v49 = vld [vmem:[#allocation4 + $0x68] sm:$0xff]  ;;  %vm319_vm7 = vcmp.eq.s32.totalorder %v1750_v3, 7  ;;  %v341_v53 = vld [vmem:[#allocation4 + $0x78] sm:$0xff]  ;;  %s888_s27 = sshll.u32 %s264_s26, 4  ;;  %s875_s30 = scalar_lea.sflag [#allocation6], %s262_s21  ;;  %s1876_s27 = int_to_ptr.vmem [resolvable:$true] %s888_s27 }
  0x9d   : > { %1162 = vmatprep.subr.bf16.mxu0 %v1523_v0  ;;  %v315_v38 = vstv %s1770_s25  ;;  %v297_v41 = vsel %vm1789_vm12, 1.0, %v290_v32  ;;  %vm303_vm15 = vmand %vm298_vm13, %vm302_vm14  ;;  %vm309_vm2 = vcmp.eq.s32.totalorder %v1752_v4, %v308_v33  ;;  %v1288_v55 = vld [vmem:[#allocation9 + $0x7c] ss:$12 sps:$4 sm:$0xff]   ;;  %v1172_v56 = vpack.c.bf16 %v339_v49, %v338_v44  ;;  %v1290_v58 = vld [vmem:[#allocation9 + $0x78] ss:$12 sps:$4 sm:$0xff]   ;;  %s1434_s13 = scalar_lea.vmem %s1876_s27, 128 }
  0x9e   : > { %vm316_vm4 = vcmp.eq.s32.totalorder %v1752_v4, %v315_v38  ;;  %v322_v42 = vstv %s1783_s19  ;;  %579 = vmatpush1.bf16.msra.mxu1 %v1278_v35  ;;  %v304_v47 = vsel %vm303_vm15, 1.0, %v297_v41  ;;  %vm1807_vm5 = vmand %vm305_vm1, %vm309_vm2  ;;  %v1292_v59 = vld [vmem:[#allocation9 + $0x94] ss:$12 sps:$4 sm:$0xff]   ;;  %v1175_v61 = vpack.c.bf16 %v341_v53, %v340_v52  ;;  %v1294_v62 = vld [vmem:[#allocation9 + $0x90] ss:$12 sps:$4 sm:$0xff]   ;;  %p1435_p13 = scmp.ne.s32.totalorder %s1876_s27, %s1434_s13  ;;  %p1950_p5 = scmp.ne.s32.totalorder %s1927_s16, 0 }
  0x9f   : > { %580 = vmatprep.subr.bf16.mxu1 %v1280_v40  ;;  %vm1812_vm6 = vmand %vm312_vm3, %vm316_vm4  ;;  %vm323_vm8 = vcmp.eq.s32.totalorder %v1752_v4, %v322_v42  ;;  %v311_v54 = vsel %vm1807_vm5, 1.0, %v304_v47  ;;  %v1271_v2 = vld [vmem:[#allocation9 + $0x8] ss:$12 sps:$4 sm:$0xff]   ;;  %v1275_v5 = vld [vmem:[#allocation9 + $0x20] ss:$12 sps:$4 sm:$0xff]   ;;  %vm716_vm10 = vcmask 1043456   ;;  %vm697_vm11 = vcmp.le.s32.totalorder %v1752_v4, %v1750_v3 }
  0xa0   : > { %1164 = vmatpush3.bf16.msra.mxu0 %v1163_v28  ;;  %vm1820_vm9 = vmand %vm319_vm7, %vm323_vm8  ;;  %v318_v60 = vsel %vm1812_vm6, 1.0, %v311_v54  ;;  %v1283_v6 = vld [vmem:[#allocation9 + $0x50] ss:$12 sps:$4 sm:$0xff]   ;;  %v1287_v7 = vld [vmem:[#allocation9 + $0x68] ss:$12 sps:$4 sm:$0xff]   ;;  %vm699_vm12 = vcmask 64512   ;;  %p1436_p6 = pnand %p1435_p13, %p1950_p5 }
  0xa1   : > { %1165 = vmatprep.subr.bf16.mxu0 %v1523_v0  ;;  %v325_v63 = vsel %vm1820_vm9, 1.0, %v318_v60  ;;  %v1291_v8 = vld [vmem:[#allocation9 + $0x80] ss:$12 sps:$4 sm:$0xff]   ;;  %v1295_v9 = vld [vmem:[#allocation9 + $0x98] ss:$12 sps:$4 sm:$0xff]   ;;  %v1306_v50 = vld [vmem:[#allocation10 + $0x30] sm:$0xff]  }
  0xa2   : > { %581 = vmatpush1.bf16.msra.mxu1 %v1282_v43  ;;  %v1296_v10 = vld [vmem:[#allocation9 + $0xac] ss:$12 sps:$4 sm:$0xff]   ;;  %v1298_v11 = vld [vmem:[#allocation9 + $0xa8] ss:$12 sps:$4 sm:$0xff]   ;;  %v1299_v12 = vld [vmem:[#allocation9 + $0xb0] ss:$12 sps:$4 sm:$0xff]   ;;  %p1437_p7 = pneg %p1436_p6 }
  0xa3   : > { %582 = vmatprep.subr.bf16.mxu1 %v1284_v45  ;;  %v342_v14 = vld [vmem:[#allocation7] sm:$0xff]  ;;  %v1300_v43 = vld [vmem:[#allocation10] sm:$0xff]   ;;  %v1301_v45 = vld [vmem:[#allocation10 + $0x8] sm:$0xff]   ;;  %s1527_s14 = smov [#allocation12]  }
  0xa4   : > { %1167 = vmatpush3.bf16.msra.mxu0 %v1166_v39  ;;  %v1303_v47 = vld [vmem:[#allocation10 + $0x18] sm:$0xff]   ;;  %v1304_v48 = vld [vmem:[#allocation10 + $0x20] sm:$0xff]   ;;  %v1305_v49 = vld [vmem:[#allocation10 + $0x28] sm:$0xff]   ;;  %s1438_s20 = sshll.u32 %s1527_s14, 4  ;;  %s1439_s20 = int_to_ptr.vmem [resolvable:$false] %s1438_s20 }
  0xa5   : > { %1168 = vmatprep.subr.bf16.mxu0 %v1523_v0  ;;  %s1440_s24 = scalar_lea.vmem %s1439_s20, 256  ;;  %p1441_p10 = scmp.lt.s32.totalorder %s1876_s27, %s1439_s20 }
  0xa6   : > { %583 = vmatpush1.bf16.msra.mxu1 %v1286_v51  ;;  %v1307_v51 = vld [vmem:[#allocation10 + $0x38] sm:$0xff]   ;;  %p1442_p11 = scmp.lt.s32.totalorder %s1440_s24, %s1434_s13 }
  0xa7   : > { %584 = vmatprep.subr.bf16.mxu1 %v1288_v55 }
  0xa8   : > { %1170 = vmatpush3.bf16.msra.mxu0 %v1169_v46  ;;  %v1302_v46 = vld [vmem:[#allocation10 + $0x10] sm:$0xff]   ;;  %p1443_p0 = por %p1442_p11, %p1441_p10 }
  0xa9   : > { %1171 = vmatprep.subr.bf16.mxu0 %v1523_v0 }
  0xaa   : > { %585 = vmatpush1.bf16.msra.mxu1 %v1290_v58  ;;  %v1014_v58 = vld [vmem:[%s1921_s5] ss:$0 sm:$0xff]  ;;  %p1444_p2 = pnand %p1443_p0, %p1437_p7 }
  0xab   : > { %586 = vmatprep.subr.bf16.mxu1 %v1292_v59 }
  0xac   : > { %1173 = vmatpush3.bf16.msra.mxu0 %v1172_v56 }
  0xad   : > { %1174 = vmatprep.subr.bf16.mxu0 %v1523_v0  ;;  %v1279_v0 = vld [vmem:[#allocation9 + $0x38] ss:$12 sps:$4 sm:$0xff]  }
  0xae   : > { %587 = vmatpush1.bf16.msra.mxu1 %v1294_v62 }
  0xaf   : > { %588 = vmatprep.subr.bf16.mxu1 %v1296_v10 }
  0xb0   : > { %1176 = vmatpush3.bf16.msra.mxu0 %v1175_v61 }
  0xb1   : > { %1101 = vmatprep.subr.bf16.mxu0 %v1525_v1 }
  0xb2   : > { %589 = vmatpush1.bf16.msra.mxu1 %v1298_v11 }
  0xb3   : > { %1099 = vmatmul.mubr.f32.vlgmr.msra.gmra.mrb[0].mxu0 %v325_v63  ;;  %1127 = vmatprep.subr.bf16.mxu1 %v1525_v1 }
  0xb4   : > { %1102 = vmatpush3.bf16.msra.mxu0 %v1271_v2  ;;  %1117 = vmatprep.mubr.msk.bf16.mxu0 %vm1524_vm0, %v1525_v1 }
  0xb5   : > { %1103 = vmatprep.subr.bf16.mxu0 %v1525_v1 }
  0xb8   : > { %1104 = vmatpush3.bf16.msra.mxu0 %v1275_v5 }
  0xb9   : > { %1105 = vmatprep.subr.bf16.mxu0 %v1525_v1 }
  0xbc   : > { %1106 = vmatpush3.bf16.msra.mxu0 %v1279_v0 }
  0xbd   : > { %1107 = vmatprep.subr.bf16.mxu0 %v1525_v1 }
  0xc0   : > { %1108 = vmatpush3.bf16.msra.mxu0 %v1283_v6 }
  0xc1   : > { %1109 = vmatprep.subr.bf16.mxu0 %v1525_v1 }
  0xc4   : > { %1110 = vmatpush3.bf16.msra.mxu0 %v1287_v7 }
  0xc5   : > { %1111 = vmatprep.subr.bf16.mxu0 %v1525_v1 }
  0xc8   : > { %1112 = vmatpush3.bf16.msra.mxu0 %v1291_v8 }
  0xc9   : > { %1113 = vmatprep.subr.bf16.mxu0 %v1525_v1 }
  0xcc   : > { %1114 = vmatpush3.bf16.msra.mxu0 %v1295_v9 }
  0xcd   : > { %1115 = vmatprep.subr.bf16.mxu0 %v1525_v1 }
  0xd0   : > { %1116 = vmatpush3.bf16.msra.mxu0 %v1299_v12 }
  0xd1   : > { %1121 = vmatprep.subr.bf16.mxu0 %v1525_v1 }
 0x186   : > { %v409_v15 = vpop.f32.mrb[0].mxu0 }
 0x187   : > { %v1842_v16 = vadd.f32 %v409_v15, %v342_v14  ;;  %v1100_v17 = vpop.f32.mrb[1].mxu0 }
 0x189   : > { %v413_v18 = vpack.c.bf16 %v1842_v16, %v1842_v16 }
 0x18b   : > { %607 = vmatmul.mubr.bf16.vlgmr.msra.gmra.mrb[0].mxu1 %v413_v18  ;;  %1118 = vmatmul.mubr.bf16.vlgmr.msra.gmra.mrb[4].mxu0 %v413_v18 }
 0x18c   : > { %1123 = vmatprep.mubr.msk.bf16.mxu0 %vm1524_vm0, %v1525_v1  ;;  %1129 = vmatprep.mubr.msk.bf16.mxu1 %vm1524_vm0, %v1525_v1 }
 0x25e   : > { %v608_v19 = vpop.f32.mrb[0].mxu1  ;;  %v649_v20 = vpop.f32.mrb[4].mxu0 }
 0x25f   : > { %v712_v21 = vpack.c.bf16 %v649_v20, %v649_v20  ;;  %v610_v22 = vpop.f32.mrb[1].mxu1  ;;  %v1119_v23 = vpop.f32.mrb[5].mxu0  ;;  %v655_v30 = vpack.c.bf16 %v608_v19, %v608_v19 }
 0x260   : > { %v656_v24 = vpack.c.bf16 %v610_v22, %v610_v22  ;;  %v612_v25 = vpop.f32.mrb[2].mxu1  ;;  %v652_v26 = vpop.f32.mrb[6].mxu0 }
 0x261   : > { %v718_v27 = vsel %vm716_vm10, %v712_v21, 0  ;;  %v613_v28 = vpop.f32.mrb[3].mxu1  ;;  %v1120_v29 = vpop.f32.mrb[7].mxu0 }
 0x262   : > { %1122 = vmatpush3.bf16.xpose.msra.mxu0 %v656_v24  ;;  %1128 = vmatpush3.bf16.msra.mxu1 %v718_v27 }
 0x263   : > { %1133 = vmatprep.subr.bf16.mxu1 %v1525_v1 }
 0x269   : > { %1124 = vmatmul.mubr.bf16.vlgmr.msra.gmra.mrb[8].mxu0 %v655_v30 }
 0x33c   : > { %v691_v31 = vpop.f32.mrb[8].mxu0 }
 0x33d   : > { %v698_v32 = vsel %vm697_vm11, %v691_v31, -1e+30  ;;  %v1125_v33 = vpop.f32.mrb[9].mxu0 }
 0x33e   : > { %v694_v34 = vpop.f32.mrb[10].mxu0  ;;  %v700_v35 = vsel %vm699_vm12, %v698_v32, -inf }
 0x33f   : > { %701 = vmax.xlane.f32.xlu0 %v700_v35  ;;  %v1126_v36 = vpop.f32.mrb[11].mxu0 }
 0x3cc   : > { %v702_v37 = vpop.xlane.xlu0 %701 }
 0x3cd   : > { %v703_v38 = vsub.f32 %v698_v32, %v702_v37 }
 0x3cf   : > { %v704_v39 = vmul.f32 1.442695, %v703_v38 }
 0x3d1   : > { %1308 = vpow2.f32 %v704_v39 }
 0x3db   : > { %v1309_v40 = vpop.eup %1308 }
 0x3dc   : > { %v706_v41 = vsel %vm699_vm12, %v1309_v40, 0.0 }
 0x3dd   : > { %707 = vadd.xlane.f32.xlu0 %v706_v41 }
 0x46a   : > { %v708_v42 = vpop.xlane.xlu0 %707 }
 0x46b   : > { %1310 = vrcp.f32 %v708_v42 }
 0x475   : > { %v1311_v3 = vpop.eup %1310 }
 0x476   : > { %v710_v4 = vmul.f32 %v1311_v3, %v1309_v40 }
 0x478   : > { %v711_v44 = vpack.c.bf16 %v710_v4, %v710_v4 }
 0x47a   : > { %1130 = vmatmul.mubr.msk.bf16.vlgmr.msra.gmra.mrb[4].mxu1 %vm699_vm12, %v711_v44 }
 0x47b   : > { %1134 = vmatpush3.bf16.msra.mxu1 %v1300_v43  ;;  %1149 = vmatprep.mubr.msk.bf16.mxu1 %vm1524_vm0, %v1525_v1 }
 0x47c   : > { %1135 = vmatprep.subr.bf16.mxu1 %v1525_v1 }
 0x47f   : > { %1136 = vmatpush3.bf16.msra.mxu1 %v1301_v45 }
 0x480   : > { %1137 = vmatprep.subr.bf16.mxu1 %v1525_v1 }
 0x483   : > { %1138 = vmatpush3.bf16.msra.mxu1 %v1302_v46 }
 0x484   : > { %1139 = vmatprep.subr.bf16.mxu1 %v1525_v1 }
 0x487   : > { %1140 = vmatpush3.bf16.msra.mxu1 %v1303_v47 }
 0x488   : > { %1141 = vmatprep.subr.bf16.mxu1 %v1525_v1 }
 0x48b   : > { %1142 = vmatpush3.bf16.msra.mxu1 %v1304_v48 }
 0x48c   : > { %1143 = vmatprep.subr.bf16.mxu1 %v1525_v1 }
 0x48f   : > { %1144 = vmatpush3.bf16.msra.mxu1 %v1305_v49 }
 0x490   : > { %1145 = vmatprep.subr.bf16.mxu1 %v1525_v1 }
 0x493   : > { %1146 = vmatpush3.bf16.msra.mxu1 %v1306_v50 }
 0x494   : > { %1147 = vmatprep.subr.bf16.mxu1 %v1525_v1 }
 0x497   : > { %1148 = vmatpush3.bf16.msra.mxu1 %v1307_v51 }
 0x54d   : > { %v754_v52 = vpop.f32.mrb[4].mxu1 }
 0x54e   : > { %v760_v53 = vadd.f32 %v754_v52, %v1842_v16  ;;  %v1131_v54 = vpop.f32.mrb[5].mxu1 }
 0x54f   : > { %v757_v55 = vpop.f32.mrb[6].mxu1 }
 0x550   : > { %v761_v56 = vpack.c.bf16 %v760_v53, %v760_v53  ;;  %v1132_v57 = vpop.f32.mrb[7].mxu1 }
 0x552   : > { %1150 = vmatmul.mubr.bf16.vlgmr.msra.gmra.mrb[8].mxu1 %v761_v56 }
 0x625   : > { %v867_v1 = vpop.f32.mrb[8].mxu1 }
 0x626   : > { %v868_v59 = vadd.f32 %v1014_v58, %v867_v1  ;;  %v1151_v60 = vpop.f32.mrb[9].mxu1 }
 0x627   : > { %v870_v61 = vpop.f32.mrb[10].mxu1 }
 0x628   : > { %873 = vst [vmem:[%s264_s26] sm:$0xff] %v868_v59  ;;  %v1152_v62 = vpop.f32.mrb[11].mxu1 }
 0x629   : > { %1447 = shalt.err (!%p1444_p2)
}
 0x62a   : > { %s1448_s18 = scalar_lea.hbm %s1874_s29, 128  ;;  %s1452_s19 = scalar_lea.hbm %s1922_s6, 256 }
 0x62b   : > { %p1449_p4 = scmp.ne.s32.totalorder %s1874_s29, %s1448_s18  ;;  %p1453_p8 = scmp.lt.u32.totalorder %s1874_s29, %s1922_s6 }
 0x62c   : > { %p1454_p12 = scmp.lt.u32.totalorder %s1452_s19, %s1448_s18  ;;  %p1456_p13 = scmp.lt.u32.totalorder %s1448_s18, %s1874_s29 }
 0x62d   : > { %p1450_p3 = pnand %p1449_p4, %p1950_p5 }
 0x62e   : > { %p1455_p1 = por %p1454_p12, %p1453_p8 }
 0x62f   : > { %p1451_p9 = pneg %p1450_p3 }
 0x630   : > { %p1457_p6 = por %p1456_p13, %p1455_p1 }
 0x632   : > { %p1458_p7 = pnand %p1457_p6, %p1451_p9 }
 0x634   : > { %1461 = shalt.err (!%p1458_p7)
}
 0x635   : > { %1193 = dma.vmem_to_hbm [thread:$0]  (%p1950_p5), %s1876_s27, 128, %s1874_s29, %s875_s30  }
 0x636 PF: > { %p1220_p10 = scmp.ge.s32.totalorder %s1510_s10, 2  ;;  %s900_s23 = sand.u32 1, %s1498_s7  }
 0x637   : > { %p1951_p11 = scmp.ne.s32.totalorder %s1928_s17, 0  ;;  %s901_s11 = scalar_lea.sflag [#allocation6], %s900_s23 }
 0x639   : > { %p1209_p0 = pnand %p1220_p10, %p1951_p11 }
 0x63b   : > { %1493 = dma.done.wait (!%p1209_p0), %s901_s11, 128  }
 0x63c   : > { %1495 = vsyncadd (!%p1209_p0), %s901_s11, 4294967168  ;;  %p23_p2 = scmp.ge.s32.totalorder %s1600_s12, 4   ;;  %s1952_s7 = smov %s1502_s8 }
 0x63d   : > { %s1953_s8 = smov %s1506_s9  ;;  %s1954_s9 = smov %s1611_s15 }
 0x63e   : > { %s1955_s10 = smov %s1600_s12  ;;  %25 = sbr.rel (!%p23_p2) target bundleno = 18 (0x12), region = 89 }
 0x645   :  { %906 = vsyncpa [#allocation5], 1 }
 0x646   :  { %908 = vsyncpa [#allocation5 + $0x1], 1 }
 0x647   :  { %909 = vsyncpa [#allocation8], 1 }
 0x648   :  { %910 = vsyncpa [#allocation11], 1 }
 0x649   :  { %911 = vsyncpa [#allocation6], 1 }
 0x64a   :  { %913 = vsyncpa [#allocation6 + $0x1], 1 }

</bundles_post_ra>
